<compile_context>
chip_gen: v7x
topology: tpu7x:2x2x1
jax: 0.10.0
libtpu: 0.0.40
codegen_flags: <defaults>
</compile_context>

<pallas_src>
import functools
import math

import jax
import jax.numpy as jnp
import numpy as np
from jax import lax
from jax.experimental import pallas as pl
from jax.experimental.pallas import tpu as pltpu


# --------------------------------------------------------------------------
# VMEM-aware tile selection
# --------------------------------------------------------------------------


def _vmem_capacity_bytes():
    try:
        cap = int(pltpu.get_tpu_info().vmem_capacity_bytes)
        if cap > 0:
            return cap
    except Exception:
        pass
    return 64 * 1024 * 1024           # conservative fallback (v7x per-core VMEM)


def _divisors_desc(n):
    return [d for d in range(n, 0, -1) if n % d == 0]


def _pick_tile_b(B, requested):
    if requested is not None:
        if B % requested:
            raise ValueError(f"tile_b {requested} must divide B={B}")
        return requested
    for c in (256, 128, 64, 32, 16, 8):
        if B % c == 0:
            return c
    return B


def _pick_tile_c(C, requested, per_class_bytes, fixed_bytes, budget):
    if requested is not None:
        if C % requested:
            raise ValueError(f"tile_c {requested} must divide C={C}")
        return requested
    # lane-friendly candidates: multiples of 128, or the whole class dim
    cands = [d for d in _divisors_desc(C) if d % 128 == 0 or d == C]
    for d in cands:                           # largest tile that fits the budget
        if fixed_bytes + d * per_class_bytes <= budget:
            return d
    return cands[-1]                          # best effort


# --------------------------------------------------------------------------
# Kernel bodies
# --------------------------------------------------------------------------


def _subcenter_cosine_tile(x_ref, w_ref, *, k):
    """cos[b, c] = max_i <xn_b, wn_{c,i}>  (inputs already L2-normalized).

    x_ref : (TILE_B, E)   w_ref : (k, TILE_C, E)   ->  (TILE_B, TILE_C) f32
    """
    xn = x_ref[...]                                     # compute dtype (bf16/f32)
    cos_t = None
    for i in range(k):                                  # k tiny -> static unroll
        wi = w_ref[i]                                   # (TILE_C, E), free leading-dim slice
        ci = lax.dot_general(                           # MXU, f32 accumulate
            xn, wi,
            dimension_numbers=(((1,), (1,)), ((), ())),
            preferred_element_type=jnp.float32)
        cos_t = ci if cos_t is None else jnp.maximum(cos_t, ci)
    return cos_t


def _cosine_kernel(x_ref, w_ref, cos_ref, *, k):
    """label is None path: just the max-pooled sub-center cosine."""
    cos_ref[...] = _subcenter_cosine_tile(x_ref, w_ref, k=k)


def _train_kernel(x_ref, w_ref, label_ref, prm_ref, cos_ref, ploss_ref,
                  *, k, s, l):
    """Labeled path: cosine tile + per-(class-tile) partial unified loss.

    The negative-class loss (2 transcendentals/elem) is computed for the full
    tile; the margin/positive-loss correction is applied only to the one
    target column per row, extracted with a masked reduce.
    """
    ci = pl.program_id(0)                               # class-tile axis (outer)

    cos_t = _subcenter_cosine_tile(x_ref, w_ref, k=k)   # (tb, tc) f32
    cos_ref[...] = cos_t                                # module returns raw cosine

    tb, tc = cos_t.shape
    prm = prm_ref[...].astype(jnp.float32)              # (tb, 4) per-sample params
    cos_m = prm[:, 0:1]                                 # cos(m_l)  (== th)
    sin_m = prm[:, 1:2]                                 # sin(m_l)
    mm_t = prm[:, 2:3]                                  # sin(m_l) * m_l
    bias = prm[:, 3:4]                                  # scalar bias (replicated)

    # negative-class loss for every element of the tile
    logit_n = jnp.clip(s * cos_t - bias, -s, s)
    n_loss = jnp.log(1.0 + jnp.exp(logit_n)) * l
    row_n = jnp.sum(n_loss, axis=-1, keepdims=True)     # (tb, 1)

    # extract the target column's cosine (at most one per row in this tile)
    class_ids = lax.broadcasted_iota(jnp.int32, (tb, tc), 1) + ci * tc
    is_tgt = (class_ids == label_ref[...])              # (tb, tc) bool
    tgt_f = jnp.where(is_tgt, 1.0, 0.0)
    tcos = jnp.sum(tgt_f * cos_t, axis=-1, keepdims=True)      # (tb, 1)
    has_tgt = jnp.sum(tgt_f, axis=-1, keepdims=True) > 0.5     # (tb, 1) bool

    # margin / positive-loss correction on (tb, 1) vectors only
    sine = jnp.sqrt(jnp.clip(1.0 - tcos * tcos, 0.0, 1.0))
    phi = tcos * cos_m + sine * sin_m
    phi = jnp.where(tcos < cos_m, phi, tcos + mm_t)
    logit_p = jnp.clip(s * phi - bias, -s, s)
    p_loss = jnp.log(1.0 + jnp.exp(-logit_p))
    t_n_loss = jnp.log(1.0 + jnp.exp(jnp.clip(s * tcos - bias, -s, s))) * l

    row = row_n + jnp.where(has_tgt, p_loss - t_n_loss, 0.0)   # (tb, 1)
    ploss_ref[...] = row.reshape(1, tb, 1)


# --------------------------------------------------------------------------
# Wrapper (mirrors Unified_SubCenterArcFaceDynamicMarginHead.forward)
# --------------------------------------------------------------------------


def subcenter_arcface_head(x, weight, label=None, *, class_counts=None,
                           bias=None, k=4, s=64.0, lambda_=0.25, a=0.5,
                           b=0.05, l=1.0, r=1.0, eps=1e-5,
                           tile_b=None, tile_c=None,
                           compute_dtype=jnp.bfloat16):
    """weight is the (out_features*k, in_features) Parameter; class_counts is
    a (out_features,) array standing in for the module's class_count_dict."""
    x = jnp.asarray(x, jnp.float32)
    weight = jnp.asarray(weight, jnp.float32)
    B, E = x.shape
    CK, E2 = weight.shape
    if E2 != E or CK % k:
        raise ValueError("weight must have shape (out_features*k, in_features)")
    C = CK // k

    # ---- one-time host-side preprocessing (NOT per-tile work) --------------
    # F.normalize(v, eps): v / max(||v||_2, eps).  Normalizing once here removes
    # all per-tile VALU/XLU/EUP normalization work from the kernel.  In a real
    # training loop the weight would be kept in this (k, C, E) bf16 layout.
    xn = x / jnp.maximum(jnp.sqrt(jnp.sum(x * x, axis=1, keepdims=True)), eps)
    wn = weight / jnp.maximum(
        jnp.sqrt(jnp.sum(weight * weight, axis=1, keepdims=True)), eps)
    # (C*k, E): row c*k + i is sub-center i of class c  ->  (k, C, E)
    w_kce = jnp.transpose(wn.reshape(C, k, E), (1, 0, 2)).astype(compute_dtype)
    xn_c = xn.astype(compute_dtype)

    # ---- VMEM-budgeted tile selection --------------------------------------
    phys = _vmem_capacity_bytes()
    vmem_limit = min(phys, max(32 * 1024 * 1024, (phys * 3) // 4))
    budget = int(vmem_limit * 0.85)
    w_isz = jnp.dtype(compute_dtype).itemsize
    x_isz = jnp.dtype(compute_dtype).itemsize

    tile_b = _pick_tile_b(B, tile_b)
    # double-buffered resident set: weight block + cosine column per class,
    # plus the x block / small per-row tensors.
    per_class_bytes = 2 * k * E * w_isz + 2 * tile_b * 4
    fixed_bytes = 2 * tile_b * E * x_isz + 2 * tile_b * 8 * 4 + (64 << 10)
    tile_c = _pick_tile_c(C, tile_c, per_class_bytes, fixed_bytes, budget)

    n_ci = C // tile_c
    n_bi = B // tile_b
    grid = (n_ci, n_bi)      # class tiles OUTER -> each weight tile DMA'd once

    x_spec = pl.BlockSpec((tile_b, E), lambda ci, bi: (bi, 0))
    w_spec = pl.BlockSpec((k, tile_c, E), lambda ci, bi: (0, ci, 0))
    cos_spec = pl.BlockSpec((tile_b, tile_c), lambda ci, bi: (bi, ci))

    cparams = pltpu.CompilerParams(
        dimension_semantics=("parallel", "parallel"),
        vmem_limit_bytes=int(vmem_limit))

    if label is None:
        kern = functools.partial(_cosine_kernel, k=k)
        return pl.pallas_call(
            kern,
            out_shape=jax.ShapeDtypeStruct((B, C), jnp.float32),
            grid=grid,
            in_specs=[x_spec, w_spec],
            out_specs=cos_spec,
            compiler_params=cparams,
        )(xn_c, w_kce)

    # ---- labeled path: per-sample dynamic margins + unified loss -----------
    if class_counts is None:
        raise ValueError("class_counts is required when label is given")
    label = jnp.asarray(label, jnp.int32)
    counts = jnp.asarray(class_counts, jnp.float32)
    # TODO(synk): the module's per-label Python dict lookup
    # (class_count_dict[str(label)]) has no in-kernel equivalent; it is
    # precomputed host-side as a per-class count array + gather.
    m_l = a * jnp.power(counts[label], -lambda_) + b            # (B,) margins
    if bias is None:
        bias = math.log(C * r * 10.0)      # module's init for the bias Parameter
    bias_col = jnp.full((B,), bias, dtype=jnp.float32)
    prm = jnp.stack(
        [jnp.cos(m_l), jnp.sin(m_l), jnp.sin(m_l) * m_l, bias_col],
        axis=1).astype(jnp.float32)                             # (B, 4)
    label2d = label.reshape(B, 1)

    label_spec = pl.BlockSpec((tile_b, 1), lambda ci, bi: (bi, 0))
    prm_spec = pl.BlockSpec((tile_b, 4), lambda ci, bi: (bi, 0))
    ploss_spec = pl.BlockSpec((1, tile_b, 1), lambda ci, bi: (ci, bi, 0))

    kern = functools.partial(_train_kernel, k=k, s=float(s), l=float(l))
    cosine, ploss = pl.pallas_call(
        kern,
        out_shape=(jax.ShapeDtypeStruct((B, C), jnp.float32),
                   jax.ShapeDtypeStruct((n_ci, B, 1), jnp.float32)),
        grid=grid,
        in_specs=[x_spec, w_spec, label_spec, prm_spec],
        out_specs=(cos_spec, ploss_spec),
        compiler_params=cparams,
    )(xn_c, w_kce, label2d, prm)

    loss = jnp.sum(ploss) / B               # loss.sum(dim=1).mean()
    return cosine, loss


# --------------------------------------------------------------------------
# Pure-JAX reference (mirrors the PyTorch forward, f32)
# --------------------------------------------------------------------------


def reference_forward(x, weight, label=None, class_counts=None, *, k=4,
                      s=64.0, lambda_=0.25, a=0.5, b=0.05, l=1.0, r=1.0,
                      bias=None, eps=1e-5):
    x = jnp.asarray(x, jnp.float32)
    weight = jnp.asarray(weight, jnp.float32)
    B = x.shape[0]
    C = weight.shape[0] // k
    xn = x / jnp.maximum(jnp.sqrt(jnp.sum(x * x, axis=1, keepdims=True)), eps)
    wn = weight / jnp.maximum(
        jnp.sqrt(jnp.sum(weight * weight, axis=1, keepdims=True)), eps)
    cos_full = jnp.dot(xn, wn.T, precision=lax.Precision.HIGHEST)
    cosine = jnp.max(cos_full.reshape(B, C, k), axis=2)
    if label is None:
        return cosine
    counts = jnp.asarray(class_counts, jnp.float32)
    m_l = a * jnp.power(counts[label], -lambda_) + b
    if bias is None:
        bias = math.log(C * r * 10.0)
    cdm = jnp.cos(m_l)[:, None]
    sdm = jnp.sin(m_l)[:, None]
    mmt = (jnp.sin(m_l) * m_l)[:, None]
    sine = jnp.sqrt(jnp.clip(1.0 - cosine * cosine, 0.0, 1.0))
    phi = cosine * cdm + sine * sdm
    phi = jnp.where(cosine < cdm, phi, cosine + mmt)
    lp = s * phi - bias
    ln = s * cosine - bias
    p_loss = jnp.log(1.0 + jnp.exp(-jnp.clip(lp, -s, s)))
    n_loss = jnp.log(1.0 + jnp.exp(jnp.clip(ln, -s, s))) * l
    onehot = jax.nn.one_hot(label, C, dtype=bool)
    loss = jnp.mean(jnp.sum(jnp.where(onehot, p_loss, n_loss), axis=1))
    return cosine, loss


# --------------------------------------------------------------------------
# Demo / correctness check
# --------------------------------------------------------------------------


if __name__ == "__main__":
    B, E, C, K = 16, 128, 384, 4            # small shapes; E = in_features
    S, LAMBDA_, A, B_MARGIN, L, R = 64.0, 0.25, 0.5, 0.05, 1.0, 1.0

    key = jax.random.PRNGKey(0)
    kx, kw, kl, kc = jax.random.split(key, 4)
    x = jax.random.normal(kx, (B, E), dtype=jnp.float32)
    # kaiming_normal_(a=1, mode='fan_in') -> std = sqrt(2/(1+1)) / sqrt(E)
    weight = jax.random.normal(kw, (C * K, E), dtype=jnp.float32) / math.sqrt(E)
    label = jax.random.randint(kl, (B,), 0, C, dtype=jnp.int32)
    class_counts = jax.random.randint(kc, (C,), 5, 500).astype(jnp.float32)
    bias = math.log(C * R * 10.0)

    hp = dict(k=K, s=S, lambda_=LAMBDA_, a=A, b=B_MARGIN, l=L, r=R, bias=bias)

    cos_r = reference_forward(x, weight, None, **hp)
    cos_r2, loss_r = reference_forward(x, weight, label, class_counts, **hp)

    # -- inference path (label is None), f32 precision check -----------------
    cos_k = subcenter_arcface_head(x, weight, None,
                                   compute_dtype=jnp.float32, **hp)
    jax.block_until_ready(cos_k)
    np.testing.assert_allclose(np.asarray(cos_k), np.asarray(cos_r),
                               rtol=1e-4, atol=1e-4)

    # -- training path, f32, multi-tile grid (3 class tiles x 2 batch tiles) -
    cos_k2, loss_k = subcenter_arcface_head(
        x, weight, label, class_counts=class_counts,
        tile_b=8, tile_c=128, compute_dtype=jnp.float32, **hp)
    jax.block_until_ready((cos_k2, loss_k))
    np.testing.assert_allclose(np.asarray(cos_k2), np.asarray(cos_r2),
                               rtol=1e-4, atol=1e-4)
    np.testing.assert_allclose(float(loss_k), float(loss_r),
                               rtol=1e-3, atol=1e-3)

    # -- training path, default fast bf16 weights / f32 accumulation ---------
    cos_b, loss_b = subcenter_arcface_head(
        x, weight, label, class_counts=class_counts, **hp)
    jax.block_until_ready((cos_b, loss_b))
    np.testing.assert_allclose(np.asarray(cos_b), np.asarray(cos_r2),
                               rtol=0.0, atol=3e-2)
    np.testing.assert_allclose(float(loss_b), float(loss_r),
                               rtol=0.15, atol=0.5)

    print("KERNEL_OK")
</pallas_src>

<mosaic_0001>
module attributes {stable_mosaic.version = 11 : i64} {
  func.func @_cosine_kernel(%arg0: i32, %arg1: i32, %arg2: memref<16x128xf32, #tpu.memory_space<vmem>>, %arg3: memref<4x384x128xf32, #tpu.memory_space<vmem>>, %arg4: memref<16x384xf32, #tpu.memory_space<vmem>>) attributes {dimension_semantics = [#tpu.dimension_semantics<parallel>, #tpu.dimension_semantics<parallel>], iteration_bounds = array<i64: 1, 1>, scalar_prefetch = 0 : i64, scratch_operands = 0 : i64, tpu.core_type = #tpu.core_type<tc>, window_params = [{transform_indices = @transform_0, window_bounds = array<i64: 16, 128>}, {transform_indices = @transform_1, window_bounds = array<i64: 4, 384, 128>}, {transform_indices = @transform_2, window_bounds = array<i64: 16, 384>}]} {
    %c0 = arith.constant 0 : index
    %c0_0 = arith.constant 0 : index
    %0 = vector.load %arg2[%c0, %c0_0] : memref<16x128xf32, #tpu.memory_space<vmem>>, vector<16x128xf32>
    %c0_1 = arith.constant 0 : index
    %c0_2 = arith.constant 0 : index
    %c0_3 = arith.constant 0 : index
    %1 = vector.load %arg3[%c0_1, %c0_2, %c0_3] : memref<4x384x128xf32, #tpu.memory_space<vmem>>, vector<1x384x128xf32>
    %2 = vector.shape_cast %1 : vector<1x384x128xf32> to vector<384x128xf32>
    %cst = arith.constant dense<0.000000e+00> : vector<16x384xf32>
    %3 = tpu.matmul %0, %2, %cst {dimension_numbers = #tpu.dot_dimension_numbers<[1], [1], [0], [0], [0, 0, 1, 0], [], []>} : vector<16x128xf32>, vector<384x128xf32>, vector<16x384xf32> -> vector<16x384xf32>
    %c1 = arith.constant 1 : index
    %c0_4 = arith.constant 0 : index
    %c0_5 = arith.constant 0 : index
    %4 = vector.load %arg3[%c1, %c0_4, %c0_5] : memref<4x384x128xf32, #tpu.memory_space<vmem>>, vector<1x384x128xf32>
    %5 = vector.shape_cast %4 : vector<1x384x128xf32> to vector<384x128xf32>
    %cst_6 = arith.constant dense<0.000000e+00> : vector<16x384xf32>
    %6 = tpu.matmul %0, %5, %cst_6 {dimension_numbers = #tpu.dot_dimension_numbers<[1], [1], [0], [0], [0, 0, 1, 0], [], []>} : vector<16x128xf32>, vector<384x128xf32>, vector<16x384xf32> -> vector<16x384xf32>
    %7 = arith.maximumf %3, %6 : vector<16x384xf32>
    %c2 = arith.constant 2 : index
    %c0_7 = arith.constant 0 : index
    %c0_8 = arith.constant 0 : index
    %8 = vector.load %arg3[%c2, %c0_7, %c0_8] : memref<4x384x128xf32, #tpu.memory_space<vmem>>, vector<1x384x128xf32>
    %9 = vector.shape_cast %8 : vector<1x384x128xf32> to vector<384x128xf32>
    %cst_9 = arith.constant dense<0.000000e+00> : vector<16x384xf32>
    %10 = tpu.matmul %0, %9, %cst_9 {dimension_numbers = #tpu.dot_dimension_numbers<[1], [1], [0], [0], [0, 0, 1, 0], [], []>} : vector<16x128xf32>, vector<384x128xf32>, vector<16x384xf32> -> vector<16x384xf32>
    %11 = arith.maximumf %7, %10 : vector<16x384xf32>
    %c3 = arith.constant 3 : index
    %c0_10 = arith.constant 0 : index
    %c0_11 = arith.constant 0 : index
    %12 = vector.load %arg3[%c3, %c0_10, %c0_11] : memref<4x384x128xf32, #tpu.memory_space<vmem>>, vector<1x384x128xf32>
    %13 = vector.shape_cast %12 : vector<1x384x128xf32> to vector<384x128xf32>
    %cst_12 = arith.constant dense<0.000000e+00> : vector<16x384xf32>
    %14 = tpu.matmul %0, %13, %cst_12 {dimension_numbers = #tpu.dot_dimension_numbers<[1], [1], [0], [0], [0, 0, 1, 0], [], []>} : vector<16x128xf32>, vector<384x128xf32>, vector<16x384xf32> -> vector<16x384xf32>
    %15 = arith.maximumf %11, %14 : vector<16x384xf32>
    %c0_13 = arith.constant 0 : index
    %c0_14 = arith.constant 0 : index
    %16 = vector.load %arg4[%c0_13, %c0_14] : memref<16x384xf32, #tpu.memory_space<vmem>>, vector<16x384xf32>
    tpu.vector_store %arg4[%c0_13, %c0_14], %15 {strides = array<i32>} : memref<16x384xf32, #tpu.memory_space<vmem>>, vector<16x384xf32>,
    return
  }
  func.func @transform_0(%arg0: i32, %arg1: i32) -> (i32, i32) {
    %c0_i32 = arith.constant 0 : i32
    %c0_i32_0 = arith.constant 0 : i32
    return %arg1, %c0_i32 : i32, i32
  }
  func.func @transform_1(%arg0: i32, %arg1: i32) -> (i32, i32, i32) {
    %c0_i32 = arith.constant 0 : i32
    %c0_i32_0 = arith.constant 0 : i32
    %c0_i32_1 = arith.constant 0 : i32
    return %c0_i32, %arg0, %c0_i32_0 : i32, i32, i32
  }
  func.func @transform_2(%arg0: i32, %arg1: i32) -> (i32, i32) {
    %c0_i32 = arith.constant 0 : i32
    return %arg1, %arg0 : i32, i32
  }
}

</mosaic_0001>

<bundles_post_ra>
// kernel: tpu_custom_call.1
= control target key start
LH: loop header
LB: loop body
LE: loop exit
PB: predicated region body
PF: predicated region fallthrough
CT: control target
= control target key end

     0   :  { %7 = vsyncpa [#allocation3], 0  ;;  %s1664_s0 = inlined_call_operand.hbm [shape: f32[16,128], index: 0, kind: input, shape index: {}]   ;;  %s1665_s1 = inlined_call_operand.hbm [shape: f32[4,384,128], index: 1, kind: input, shape index: {}]   ;;  %s1666_s2 = inlined_call_operand.hbm [shape: f32[16,384], index: 2, kind: output, shape index: {}]  }
   0x1   :  { %8 = vsyncpa [#allocation6], 0 }
   0x2   :  { %9 = vsyncpa [#allocation4], 0  ;;  %s1578_s9 = smov [#allocation2]   ;;  %s1506_s13 = scalar_lea.hbm %s1664_s0, 256 }
   0x3   :  { %s15_s10 = sshll.u32 %s1578_s9, 4  ;;  %p1507_p0 = scmp.ne.s32.totalorder %s1664_s0, %s1506_s13  ;;  %s16_s10 = int_to_ptr.vmem [resolvable:$true] %s15_s10 }
   0x4   :  { %p1510_p1 = scmp.lt.u32.totalorder %s1506_s13, %s1664_s0 }
   0x6   :  { %p1512_p2 = pnand %p1510_p1, %p1507_p0 }
   0x8   :  { %1515 = shalt.err (!%p1512_p2)
}
   0x9   :  { %s1516_s18 = scalar_lea.vmem %s16_s10, 256  ;;  %p1521_p4 = scmp.lt.s32.totalorder %s16_s10, %s16_s10 }
   0xa   :  { %p1517_p3 = scmp.ne.s32.totalorder %s16_s10, %s1516_s18  ;;  %p1522_p5 = scmp.lt.s32.totalorder %s1516_s18, %s1516_s18 }
   0xc   :  { %p1523_p6 = por %p1522_p5, %p1521_p4 }
   0xe   :  { %p1524_p7 = pnand %p1523_p6, %p1517_p3 }
  0x10   :  { %1527 = shalt.err (!%p1524_p7)
}
  0x11   :  { %s1579_s19 = smov 128   ;;  %s1580_s20 = smov 8  }
  0x12   :  { %21 = dma.hbm_to_vmem [thread:$0]  %s1664_s0, 256, %s16_s10, [#allocation3], %s1579_s19, %s1579_s19, %s1580_s20  }
  0x13   :  { %s1581_s23 = smov [#allocation5]   ;;  %s1528_s27 = scalar_lea.hbm %s1665_s1, 24576 }
  0x14   :  { %s27_s24 = sshll.u32 %s1581_s23, 4  ;;  %p1529_p8 = scmp.ne.s32.totalorder %s1665_s1, %s1528_s27  ;;  %s28_s24 = int_to_ptr.vmem [resolvable:$true] %s27_s24 }
  0x15   :  { %p1532_p9 = scmp.lt.u32.totalorder %s1528_s27, %s1665_s1 }
  0x17   :  { %p1534_p10 = pnand %p1532_p9, %p1529_p8 }
  0x19   :  { %1537 = shalt.err (!%p1534_p10)
}
  0x1a   :  { %s1538_s4 = scalar_lea.vmem %s28_s24, 24576  ;;  %p1543_p12 = scmp.lt.s32.totalorder %s28_s24, %s28_s24 }
  0x1b   :  { %p1539_p11 = scmp.ne.s32.totalorder %s28_s24, %s1538_s4  ;;  %p1544_p13 = scmp.lt.s32.totalorder %s1538_s4, %s1538_s4 }
  0x1d   :  { %p1545_p0 = por %p1544_p13, %p1543_p12 }
  0x1f   :  { %p1546_p1 = pnand %p1545_p0, %p1539_p11 }
  0x21   :  { %1549 = shalt.err (!%p1546_p1)
}
  0x22   :  { %33 = dma.hbm_to_vmem [thread:$0]  %s1665_s1, 24576, %s28_s24, [#allocation6], %s1579_s19, %s1579_s19, %s1580_s20  }
  0x23   :  { %1572 = dma.done.wait [#allocation3], 256  }
  0x24   :  { %1573 = vsyncadd [#allocation3], 4294967040 }
  0x25   :  { %1574 = dma.done.wait [#allocation6], 24576  }
  0x26   :  { %1575 = vsyncadd [#allocation6], 4294942720  ;;  %v58_v0 = vld [vmem:[#allocation5 + $0x80] sm:$0xff]  ;;  %v59_v1 = vld [vmem:[#allocation5 + $0x88] sm:$0xff]  ;;  %s1582_s1 = smov [#allocation7]  }
  0x27   :  { %v74_v2 = vld [vmem:[#allocation5 + $0x100] sm:$0xff]  ;;  %v1243_v3 = vpack.c.bf16 %v59_v1, %v58_v0  ;;  %v75_v4 = vld [vmem:[#allocation5 + $0x108] sm:$0xff]  ;;  %v60_v9 = vld [vmem:[#allocation5 + $0x90] sm:$0xff]  ;;  %s874_s6 = sshll.u32 %s1582_s1, 4  ;;  %s875_s6 = int_to_ptr.vmem [resolvable:$true] %s874_s6 }
  0x28   :  { %v42_v5 = vld [vmem:[#allocation5] sm:$0xff]  ;;  %v43_v6 = vld [vmem:[#allocation5 + $0x8] sm:$0xff]  ;;  %v1275_v7 = vpack.c.bf16 %v75_v4, %v74_v2  ;;  %v61_v10 = vld [vmem:[#allocation5 + $0x98] sm:$0xff]  ;;  %s1550_s7 = scalar_lea.vmem %s875_s6, 768  ;;  %p1555_p3 = scmp.lt.s32.totalorder %s875_s6, %s875_s6 }
  0x29   :  { %v1245_v8 = vpack.c.bf16 %v43_v6, %v42_v5  ;;  %v76_v11 = vld [vmem:[#allocation5 + $0x110] sm:$0xff]  ;;  %1244 = vmatprep.subr.bf16.mxu0 %v1243_v3  ;;  %v1247_v12 = vpack.c.bf16 %v61_v10, %v60_v9  ;;  %v77_v13 = vld [vmem:[#allocation5 + $0x118] sm:$0xff]  ;;  %v62_v17 = vld [vmem:[#allocation5 + $0xa0] sm:$0xff]  ;;  %p1551_p2 = scmp.ne.s32.totalorder %s875_s6, %s1550_s7  ;;  %p1556_p4 = scmp.lt.s32.totalorder %s1550_s7, %s1550_s7 }
  0x2a   :  { %1276 = vmatprep.subr.bf16.mxu1 %v1275_v7  ;;  %v1279_v14 = vpack.c.bf16 %v77_v13, %v76_v11  ;;  %v44_v15 = vld [vmem:[#allocation5 + $0x10] sm:$0xff]  ;;  %v45_v16 = vld [vmem:[#allocation5 + $0x18] sm:$0xff]  ;;  %v63_v18 = vld [vmem:[#allocation5 + $0xa8] sm:$0xff] }
  0x2b   :  { %1246 = vmatpush3.bf16.xpose.msra.mxu0 %v1245_v8  ;;  %1278 = vmatpush3.bf16.xpose.msra.mxu1 %v1275_v7  ;;  %v78_v19 = vld [vmem:[#allocation5 + $0x120] sm:$0xff]  ;;  %v79_v20 = vld [vmem:[#allocation5 + $0x128] sm:$0xff]  ;;  %v1249_v21 = vpack.c.bf16 %v45_v16, %v44_v15  ;;  %v1251_v22 = vpack.c.bf16 %v63_v18, %v62_v17  ;;  %v64_v26 = vld [vmem:[#allocation5 + $0xb0] sm:$0xff]  ;;  %p1557_p5 = por %p1556_p4, %p1555_p3 }
  0x2c   :  { %1248 = vmatprep.subr.bf16.mxu0 %v1247_v12  ;;  %1280 = vmatprep.subr.bf16.mxu1 %v1279_v14  ;;  %v1283_v23 = vpack.c.bf16 %v79_v20, %v78_v19  ;;  %v46_v24 = vld [vmem:[#allocation5 + $0x20] sm:$0xff]  ;;  %v47_v25 = vld [vmem:[#allocation5 + $0x28] sm:$0xff]  ;;  %v65_v27 = vld [vmem:[#allocation5 + $0xb8] sm:$0xff] }
  0x2d   :  { %v80_v28 = vld [vmem:[#allocation5 + $0x130] sm:$0xff]  ;;  %v81_v29 = vld [vmem:[#allocation5 + $0x138] sm:$0xff]  ;;  %v1253_v30 = vpack.c.bf16 %v47_v25, %v46_v24  ;;  %v1255_v32 = vpack.c.bf16 %v65_v27, %v64_v26  ;;  %v66_v36 = vld [vmem:[#allocation5 + $0xc0] sm:$0xff]  ;;  %p1558_p6 = pnand %p1557_p5, %p1551_p2 }
  0x2e   :  { %v1624_v31 = vld [vmem:[#allocation2] sm:$0xff]  ;;  %v1287_v33 = vpack.c.bf16 %v81_v29, %v80_v28  ;;  %v49_v35 = vld [vmem:[#allocation5 + $0x38] sm:$0xff]  ;;  %v67_v37 = vld [vmem:[#allocation5 + $0xc8] sm:$0xff] }
  0x2f   :  { %919 = vmatprep.mubr.f32.mxu0 %v1624_v31  ;;  %1135 = vmatprep.mubr.f32.mxu1 %v1624_v31  ;;  %v48_v34 = vld [vmem:[#allocation5 + $0x30] sm:$0xff]  ;;  %v82_v38 = vld [vmem:[#allocation5 + $0x140] sm:$0xff]  ;;  %v83_v39 = vld [vmem:[#allocation5 + $0x148] sm:$0xff]  ;;  %v1259_v41 = vpack.c.bf16 %v67_v37, %v66_v36 }
  0x30   :  { %v1257_v40 = vpack.c.bf16 %v49_v35, %v48_v34  ;;  %v1291_v42 = vpack.c.bf16 %v83_v39, %v82_v38  ;;  %v50_v43 = vld [vmem:[#allocation5 + $0x40] sm:$0xff]  ;;  %v51_v44 = vld [vmem:[#allocation5 + $0x48] sm:$0xff]  ;;  %v68_v45 = vld [vmem:[#allocation5 + $0xd0] sm:$0xff] }
  0x31   :  { %v69_v46 = vld [vmem:[#allocation5 + $0xd8] sm:$0xff]  ;;  %v84_v47 = vld [vmem:[#allocation5 + $0x150] sm:$0xff]  ;;  %v1261_v49 = vpack.c.bf16 %v51_v44, %v50_v43  ;;  %v70_v54 = vld [vmem:[#allocation5 + $0xe0] sm:$0xff] }
  0x32   :  { %v85_v48 = vld [vmem:[#allocation5 + $0x158] sm:$0xff]  ;;  %v1263_v50 = vpack.c.bf16 %v69_v46, %v68_v45  ;;  %v52_v52 = vld [vmem:[#allocation5 + $0x50] sm:$0xff]  ;;  %v71_v55 = vld [vmem:[#allocation5 + $0xe8] sm:$0xff] }
  0x33   :  { %1250 = vmatpush3.bf16.xpose.msra.mxu0 %v1249_v21  ;;  %1282 = vmatpush3.bf16.xpose.msra.mxu1 %v1279_v14  ;;  %v1295_v51 = vpack.c.bf16 %v85_v48, %v84_v47  ;;  %v53_v53 = vld [vmem:[#allocation5 + $0x58] sm:$0xff]  ;;  %v86_v56 = vld [vmem:[#allocation5 + $0x160] sm:$0xff]  ;;  %v87_v57 = vld [vmem:[#allocation5 + $0x168] sm:$0xff]  ;;  %v1267_v59 = vpack.c.bf16 %v71_v55, %v70_v54 }
  0x34   :  { %1252 = vmatprep.subr.bf16.mxu0 %v1251_v22  ;;  %1284 = vmatprep.subr.bf16.mxu1 %v1283_v23  ;;  %v1265_v58 = vpack.c.bf16 %v53_v53, %v52_v52  ;;  %v1299_v60 = vpack.c.bf16 %v87_v57, %v86_v56  ;;  %v54_v61 = vld [vmem:[#allocation5 + $0x60] sm:$0xff]  ;;  %v55_v62 = vld [vmem:[#allocation5 + $0x68] sm:$0xff]  ;;  %v72_v63 = vld [vmem:[#allocation5 + $0xf0] sm:$0xff] }
  0x35   :  { %v73_v0 = vld [vmem:[#allocation5 + $0xf8] sm:$0xff]  ;;  %v88_v1 = vld [vmem:[#allocation5 + $0x170] sm:$0xff]  ;;  %v1269_v3 = vpack.c.bf16 %v55_v62, %v54_v61  ;;  %v259_v8 = vld [vmem:[#allocation5 + $0x200] sm:$0xff] }
  0x36   :  { %v89_v2 = vld [vmem:[#allocation5 + $0x178] sm:$0xff]  ;;  %v1271_v4 = vpack.c.bf16 %v73_v0, %v72_v63  ;;  %v56_v6 = vld [vmem:[#allocation5 + $0x70] sm:$0xff]  ;;  %v260_v9 = vld [vmem:[#allocation5 + $0x208] sm:$0xff] }
  0x37   :  { %v1303_v5 = vpack.c.bf16 %v89_v2, %v88_v1  ;;  %v57_v7 = vld [vmem:[#allocation5 + $0x78] sm:$0xff]  ;;  %v275_v10 = vld [vmem:[#allocation5 + $0x280] sm:$0xff]  ;;  %v276_v11 = vld [vmem:[#allocation5 + $0x288] sm:$0xff]  ;;  %v1307_v13 = vpack.c.bf16 %v260_v9, %v259_v8 }
  0x38   :  { %v1273_v12 = vpack.c.bf16 %v57_v7, %v56_v6  ;;  %v1339_v14 = vpack.c.bf16 %v276_v11, %v275_v10  ;;  %v243_v15 = vld [vmem:[#allocation5 + $0x180] sm:$0xff]  ;;  %v244_v16 = vld [vmem:[#allocation5 + $0x188] sm:$0xff]  ;;  %v261_v17 = vld [vmem:[#allocation5 + $0x210] sm:$0xff] }
  0x39   :  { %v262_v18 = vld [vmem:[#allocation5 + $0x218] sm:$0xff]  ;;  %v277_v19 = vld [vmem:[#allocation5 + $0x290] sm:$0xff]  ;;  %v1309_v21 = vpack.c.bf16 %v244_v16, %v243_v15  ;;  %v263_v27 = vld [vmem:[#allocation5 + $0x220] sm:$0xff] }
  0x3a   :  { %v278_v20 = vld [vmem:[#allocation5 + $0x298] sm:$0xff]  ;;  %v245_v25 = vld [vmem:[#allocation5 + $0x190] sm:$0xff]  ;;  %v264_v28 = vld [vmem:[#allocation5 + $0x228] sm:$0xff] }
  0x3b   :  { %1254 = vmatpush3.bf16.xpose.msra.mxu0 %v1253_v30  ;;  %1286 = vmatpush3.bf16.xpose.msra.mxu1 %v1283_v23  ;;  %v1628_v22 = vld [vmem:[#allocation2 + $0x8] sm:$0xff]  ;;  %v1311_v23 = vpack.c.bf16 %v262_v18, %v261_v17  ;;  %v1343_v24 = vpack.c.bf16 %v278_v20, %v277_v19  ;;  %v279_v29 = vld [vmem:[#allocation5 + $0x2a0] sm:$0xff]  ;;  %v280_v30 = vld [vmem:[#allocation5 + $0x2a8] sm:$0xff] }
  0x3c   :  { %1256 = vmatprep.subr.bf16.mxu0 %v1255_v32  ;;  %1288 = vmatprep.subr.bf16.mxu1 %v1287_v33  ;;  %v246_v26 = vld [vmem:[#allocation5 + $0x198] sm:$0xff]  ;;  %v1347_v34 = vpack.c.bf16 %v280_v30, %v279_v29  ;;  %v247_v35 = vld [vmem:[#allocation5 + $0x1a0] sm:$0xff]  ;;  %v248_v36 = vld [vmem:[#allocation5 + $0x1a8] sm:$0xff] }
  0x3d   :  { %v1313_v32 = vpack.c.bf16 %v246_v26, %v245_v25  ;;  %v265_v37 = vld [vmem:[#allocation5 + $0x230] sm:$0xff]  ;;  %v266_v38 = vld [vmem:[#allocation5 + $0x238] sm:$0xff]  ;;  %v267_v46 = vld [vmem:[#allocation5 + $0x240] sm:$0xff] }
  0x3e   :  { %v281_v39 = vld [vmem:[#allocation5 + $0x2b0] sm:$0xff]  ;;  %v250_v45 = vld [vmem:[#allocation5 + $0x1b8] sm:$0xff]  ;;  %v268_v47 = vld [vmem:[#allocation5 + $0x248] sm:$0xff] }
  0x3f   :  { %v249_v44 = vld [vmem:[#allocation5 + $0x1b0] sm:$0xff]  ;;  %v283_v48 = vld [vmem:[#allocation5 + $0x2c0] sm:$0xff]  ;;  %v252_v54 = vld [vmem:[#allocation5 + $0x1c8] sm:$0xff] }
  0x40   :  { %v251_v53 = vld [vmem:[#allocation5 + $0x1c0] sm:$0xff]  ;;  %v269_v55 = vld [vmem:[#allocation5 + $0x250] sm:$0xff]  ;;  %v270_v56 = vld [vmem:[#allocation5 + $0x258] sm:$0xff] }
  0x41   :  { %v285_v57 = vld [vmem:[#allocation5 + $0x2d0] sm:$0xff]  ;;  %v254_v63 = vld [vmem:[#allocation5 + $0x1d8] sm:$0xff]  ;;  %v271_v0 = vld [vmem:[#allocation5 + $0x260] sm:$0xff] }
  0x42   :  { %v253_v62 = vld [vmem:[#allocation5 + $0x1d0] sm:$0xff]  ;;  %v272_v1 = vld [vmem:[#allocation5 + $0x268] sm:$0xff]  ;;  %v287_v2 = vld [vmem:[#allocation5 + $0x2e0] sm:$0xff] }
  0x43   :  { %1258 = vmatpush3.bf16.xpose.msra.mxu0 %v1257_v40  ;;  %1290 = vmatpush3.bf16.xpose.msra.mxu1 %v1287_v33  ;;  %v1315_v33 = vpack.c.bf16 %v264_v28, %v263_v27  ;;  %v282_v40 = vld [vmem:[#allocation5 + $0x2b8] sm:$0xff]  ;;  %v255_v7 = vld [vmem:[#allocation5 + $0x1e0] sm:$0xff]  ;;  %v256_v8 = vld [vmem:[#allocation5 + $0x1e8] sm:$0xff] }
  0x44   :  { %1260 = vmatprep.subr.bf16.mxu0 %v1259_v41  ;;  %1292 = vmatprep.subr.bf16.mxu1 %v1291_v42  ;;  %v1317_v41 = vpack.c.bf16 %v248_v36, %v247_v35  ;;  %v1351_v43 = vpack.c.bf16 %v282_v40, %v281_v39  ;;  %v273_v9 = vld [vmem:[#allocation5 + $0x270] sm:$0xff]  ;;  %v274_v10 = vld [vmem:[#allocation5 + $0x278] sm:$0xff]  ;;  %v466_v18 = vld [vmem:[#allocation5 + $0x380] sm:$0xff] }
  0x45   :  { %v289_v11 = vld [vmem:[#allocation5 + $0x2f0] sm:$0xff]  ;;  %v258_v17 = vld [vmem:[#allocation5 + $0x1f8] sm:$0xff]  ;;  %v467_v19 = vld [vmem:[#allocation5 + $0x388] sm:$0xff] }
  0x46   :  { %v257_v16 = vld [vmem:[#allocation5 + $0x1f0] sm:$0xff]  ;;  %v482_v20 = vld [vmem:[#allocation5 + $0x400] sm:$0xff]  ;;  %v451_v27 = vld [vmem:[#allocation5 + $0x308] sm:$0xff] }
  0x47   :  { %v450_v26 = vld [vmem:[#allocation5 + $0x300] sm:$0xff]  ;;  %v468_v28 = vld [vmem:[#allocation5 + $0x390] sm:$0xff]  ;;  %v469_v29 = vld [vmem:[#allocation5 + $0x398] sm:$0xff] }
  0x48   :  { %v484_v30 = vld [vmem:[#allocation5 + $0x410] sm:$0xff]  ;;  %v471_v39 = vld [vmem:[#allocation5 + $0x3a8] sm:$0xff]  ;;  %v486_v40 = vld [vmem:[#allocation5 + $0x420] sm:$0xff] }
  0x49   :  { %v452_v36 = vld [vmem:[#allocation5 + $0x310] sm:$0xff] }
  0x4b   :  { %1262 = vmatpush3.bf16.xpose.msra.mxu0 %v1261_v49  ;;  %1294 = vmatpush3.bf16.xpose.msra.mxu1 %v1291_v42  ;;  %v1319_v42 = vpack.c.bf16 %v266_v38, %v265_v37  ;;  %v284_v49 = vld [vmem:[#allocation5 + $0x2c8] sm:$0xff]  ;;  %v453_v37 = vld [vmem:[#allocation5 + $0x318] sm:$0xff]  ;;  %v470_v38 = vld [vmem:[#allocation5 + $0x3a0] sm:$0xff] }
  0x4c   :  { %1264 = vmatprep.subr.bf16.mxu0 %v1263_v50  ;;  %1296 = vmatprep.subr.bf16.mxu1 %v1295_v51  ;;  %v1321_v50 = vpack.c.bf16 %v250_v45, %v249_v44  ;;  %v1355_v52 = vpack.c.bf16 %v284_v49, %v283_v48  ;;  %v454_v45 = vld [vmem:[#allocation5 + $0x320] sm:$0xff]  ;;  %v473_v48 = vld [vmem:[#allocation5 + $0x3b8] sm:$0xff]  ;;  %v488_v49 = vld [vmem:[#allocation5 + $0x430] sm:$0xff] }
  0x53   :  { %1266 = vmatpush3.bf16.xpose.msra.mxu0 %v1265_v58  ;;  %1298 = vmatpush3.bf16.xpose.msra.mxu1 %v1295_v51  ;;  %v1323_v51 = vpack.c.bf16 %v268_v47, %v267_v46  ;;  %v286_v58 = vld [vmem:[#allocation5 + $0x2d8] sm:$0xff]  ;;  %v455_v46 = vld [vmem:[#allocation5 + $0x328] sm:$0xff]  ;;  %v472_v47 = vld [vmem:[#allocation5 + $0x3b0] sm:$0xff] }
  0x54   :  { %1268 = vmatprep.subr.bf16.mxu0 %v1267_v59  ;;  %1300 = vmatprep.subr.bf16.mxu1 %v1299_v60  ;;  %v1325_v59 = vpack.c.bf16 %v252_v54, %v251_v53  ;;  %v1359_v61 = vpack.c.bf16 %v286_v58, %v285_v57  ;;  %v456_v54 = vld [vmem:[#allocation5 + $0x330] sm:$0xff]  ;;  %v475_v57 = vld [vmem:[#allocation5 + $0x3c8] sm:$0xff]  ;;  %v490_v58 = vld [vmem:[#allocation5 + $0x440] sm:$0xff] }
  0x5b   :  { %1270 = vmatpush3.bf16.xpose.msra.mxu0 %v1269_v3  ;;  %1302 = vmatpush3.bf16.xpose.msra.mxu1 %v1299_v60  ;;  %v1327_v60 = vpack.c.bf16 %v270_v56, %v269_v55  ;;  %v288_v3 = vld [vmem:[#allocation5 + $0x2e8] sm:$0xff]  ;;  %v457_v55 = vld [vmem:[#allocation5 + $0x338] sm:$0xff]  ;;  %v474_v56 = vld [vmem:[#allocation5 + $0x3c0] sm:$0xff] }
  0x5c   :  { %1272 = vmatprep.subr.bf16.mxu0 %v1271_v4  ;;  %1304 = vmatprep.subr.bf16.mxu1 %v1303_v5  ;;  %v1329_v4 = vpack.c.bf16 %v254_v63, %v253_v62  ;;  %v1363_v6 = vpack.c.bf16 %v288_v3, %v287_v2  ;;  %v458_v63 = vld [vmem:[#allocation5 + $0x340] sm:$0xff]  ;;  %v477_v2 = vld [vmem:[#allocation5 + $0x3d8] sm:$0xff]  ;;  %v492_v3 = vld [vmem:[#allocation5 + $0x450] sm:$0xff] }
  0x63   :  { %1274 = vmatpush3.bf16.xpose.msra.mxu0 %v1273_v12  ;;  %1306 = vmatpush3.bf16.xpose.msra.mxu1 %v1303_v5  ;;  %v1331_v5 = vpack.c.bf16 %v272_v1, %v271_v0  ;;  %v290_v12 = vld [vmem:[#allocation5 + $0x2f8] sm:$0xff]  ;;  %v459_v0 = vld [vmem:[#allocation5 + $0x348] sm:$0xff]  ;;  %v476_v1 = vld [vmem:[#allocation5 + $0x3d0] sm:$0xff] }
  0x64   :  { %1308 = vmatprep.subr.bf16.mxu0 %v1307_v13  ;;  %1340 = vmatprep.subr.bf16.mxu1 %v1339_v14  ;;  %v1333_v13 = vpack.c.bf16 %v256_v8, %v255_v7  ;;  %v1367_v15 = vpack.c.bf16 %v290_v12, %v289_v11  ;;  %v460_v8 = vld [vmem:[#allocation5 + $0x350] sm:$0xff]  ;;  %v479_v11 = vld [vmem:[#allocation5 + $0x3e8] sm:$0xff]  ;;  %v494_v12 = vld [vmem:[#allocation5 + $0x460] sm:$0xff] }
  0x6a   :  { %920 = vmatmul.mubr.f32.vlgmr.msra.gmra.mrb[0].mxu0 %v1624_v31  ;;  %1136 = vmatmul.mubr.f32.vlgmr.msra.gmra.mrb[0].mxu1 %v1628_v22 }
  0x6b   :  { %1310 = vmatpush3.bf16.xpose.msra.mxu0 %v1309_v21  ;;  %1342 = vmatpush3.bf16.xpose.msra.mxu1 %v1339_v14  ;;  %v1335_v14 = vpack.c.bf16 %v274_v10, %v273_v9  ;;  %v483_v21 = vld [vmem:[#allocation5 + $0x408] sm:$0xff]  ;;  %v461_v9 = vld [vmem:[#allocation5 + $0x358] sm:$0xff]  ;;  %v478_v10 = vld [vmem:[#allocation5 + $0x3e0] sm:$0xff] }
  0x6c   :  { %1312 = vmatprep.subr.bf16.mxu0 %v1311_v23  ;;  %1344 = vmatprep.subr.bf16.mxu1 %v1343_v24  ;;  %v1337_v23 = vpack.c.bf16 %v258_v17, %v257_v16  ;;  %v1403_v25 = vpack.c.bf16 %v483_v21, %v482_v20  ;;  %v462_v17 = vld [vmem:[#allocation5 + $0x360] sm:$0xff]  ;;  %v481_v20 = vld [vmem:[#allocation5 + $0x3f8] sm:$0xff]  ;;  %v496_v21 = vld [vmem:[#allocation5 + $0x470] sm:$0xff] }
  0x6d   :  { %921 = vmatprep.mubr.f32.mxu0 %v1628_v22  ;;  %1170 = vmatprep.mubr.f32.mxu1 %v1624_v31 }
  0x6e   :  { %922 = vmatmul.mubr.f32.gmra.mrb[2].mxu0 %v1628_v22 }
  0x6f   :  { %973 = vmatprep.mubr.f32.mxu0 %v1624_v31 }
  0x73   :  { %1314 = vmatpush3.bf16.xpose.msra.mxu0 %v1313_v32  ;;  %1346 = vmatpush3.bf16.xpose.msra.mxu1 %v1343_v24  ;;  %v1371_v24 = vpack.c.bf16 %v467_v19, %v466_v18  ;;  %v485_v32 = vld [vmem:[#allocation5 + $0x418] sm:$0xff]  ;;  %v463_v18 = vld [vmem:[#allocation5 + $0x368] sm:$0xff]  ;;  %v480_v19 = vld [vmem:[#allocation5 + $0x3f0] sm:$0xff] }
  0x74   :  { %1316 = vmatprep.subr.bf16.mxu0 %v1315_v33  ;;  %1348 = vmatprep.subr.bf16.mxu1 %v1347_v34  ;;  %v1373_v33 = vpack.c.bf16 %v451_v27, %v450_v26  ;;  %v1407_v35 = vpack.c.bf16 %v485_v32, %v484_v30  ;;  %v464_v27 = vld [vmem:[#allocation5 + $0x370] sm:$0xff]  ;;  %v674_v30 = vld [vmem:[#allocation5 + $0x508] sm:$0xff]  ;;  %v689_v32 = vld [vmem:[#allocation5 + $0x580] sm:$0xff] }
  0x7b   :  { %1318 = vmatpush3.bf16.xpose.msra.mxu0 %v1317_v41  ;;  %1350 = vmatpush3.bf16.xpose.msra.mxu1 %v1347_v34  ;;  %v1375_v34 = vpack.c.bf16 %v469_v29, %v468_v28  ;;  %v487_v41 = vld [vmem:[#allocation5 + $0x428] sm:$0xff]  ;;  %v465_v28 = vld [vmem:[#allocation5 + $0x378] sm:$0xff]  ;;  %v673_v29 = vld [vmem:[#allocation5 + $0x500] sm:$0xff] }
  0x7c   :  { %1320 = vmatprep.subr.bf16.mxu0 %v1319_v42  ;;  %1352 = vmatprep.subr.bf16.mxu1 %v1351_v43  ;;  %v1377_v42 = vpack.c.bf16 %v453_v37, %v452_v36  ;;  %v1411_v44 = vpack.c.bf16 %v487_v41, %v486_v40  ;;  %v657_v37 = vld [vmem:[#allocation5 + $0x480] sm:$0xff]  ;;  %v676_v40 = vld [vmem:[#allocation5 + $0x518] sm:$0xff]  ;;  %v691_v41 = vld [vmem:[#allocation5 + $0x590] sm:$0xff] }
  0x83   :  { %1322 = vmatpush3.bf16.xpose.msra.mxu0 %v1321_v50  ;;  %1354 = vmatpush3.bf16.xpose.msra.mxu1 %v1351_v43  ;;  %v1379_v43 = vpack.c.bf16 %v471_v39, %v470_v38  ;;  %v489_v50 = vld [vmem:[#allocation5 + $0x438] sm:$0xff]  ;;  %v658_v38 = vld [vmem:[#allocation5 + $0x488] sm:$0xff]  ;;  %v675_v39 = vld [vmem:[#allocation5 + $0x510] sm:$0xff] }
  0x84   :  { %1324 = vmatprep.subr.bf16.mxu0 %v1323_v51  ;;  %1356 = vmatprep.subr.bf16.mxu1 %v1355_v52  ;;  %v1381_v51 = vpack.c.bf16 %v455_v46, %v454_v45  ;;  %v1415_v53 = vpack.c.bf16 %v489_v50, %v488_v49  ;;  %v659_v46 = vld [vmem:[#allocation5 + $0x490] sm:$0xff]  ;;  %v678_v49 = vld [vmem:[#allocation5 + $0x528] sm:$0xff]  ;;  %v693_v50 = vld [vmem:[#allocation5 + $0x5a0] sm:$0xff] }
  0x8b   :  { %1326 = vmatpush3.bf16.xpose.msra.mxu0 %v1325_v59  ;;  %1358 = vmatpush3.bf16.xpose.msra.mxu1 %v1355_v52  ;;  %v1383_v52 = vpack.c.bf16 %v473_v48, %v472_v47  ;;  %v491_v59 = vld [vmem:[#allocation5 + $0x448] sm:$0xff]  ;;  %v660_v47 = vld [vmem:[#allocation5 + $0x498] sm:$0xff]  ;;  %v677_v48 = vld [vmem:[#allocation5 + $0x520] sm:$0xff] }
  0x8c   :  { %1328 = vmatprep.subr.bf16.mxu0 %v1327_v60  ;;  %1360 = vmatprep.subr.bf16.mxu1 %v1359_v61  ;;  %v1385_v60 = vpack.c.bf16 %v457_v55, %v456_v54  ;;  %v1419_v62 = vpack.c.bf16 %v491_v59, %v490_v58  ;;  %v661_v55 = vld [vmem:[#allocation5 + $0x4a0] sm:$0xff]  ;;  %v680_v58 = vld [vmem:[#allocation5 + $0x538] sm:$0xff]  ;;  %v695_v59 = vld [vmem:[#allocation5 + $0x5b0] sm:$0xff] }
  0x93   :  { %1330 = vmatpush3.bf16.xpose.msra.mxu0 %v1329_v4  ;;  %1362 = vmatpush3.bf16.xpose.msra.mxu1 %v1359_v61  ;;  %v1387_v61 = vpack.c.bf16 %v475_v57, %v474_v56  ;;  %v493_v4 = vld [vmem:[#allocation5 + $0x458] sm:$0xff]  ;;  %v662_v56 = vld [vmem:[#allocation5 + $0x4a8] sm:$0xff]  ;;  %v679_v57 = vld [vmem:[#allocation5 + $0x530] sm:$0xff] }
  0x94   :  { %1332 = vmatprep.subr.bf16.mxu0 %v1331_v5  ;;  %1364 = vmatprep.subr.bf16.mxu1 %v1363_v6  ;;  %v1389_v5 = vpack.c.bf16 %v459_v0, %v458_v63  ;;  %v1423_v7 = vpack.c.bf16 %v493_v4, %v492_v3  ;;  %v663_v0 = vld [vmem:[#allocation5 + $0x4b0] sm:$0xff]  ;;  %v682_v3 = vld [vmem:[#allocation5 + $0x548] sm:$0xff]  ;;  %v697_v4 = vld [vmem:[#allocation5 + $0x5c0] sm:$0xff] }
  0x9b   :  { %1334 = vmatpush3.bf16.xpose.msra.mxu0 %v1333_v13  ;;  %1366 = vmatpush3.bf16.xpose.msra.mxu1 %v1363_v6  ;;  %v1391_v6 = vpack.c.bf16 %v477_v2, %v476_v1  ;;  %v495_v13 = vld [vmem:[#allocation5 + $0x468] sm:$0xff]  ;;  %v664_v1 = vld [vmem:[#allocation5 + $0x4b8] sm:$0xff]  ;;  %v681_v2 = vld [vmem:[#allocation5 + $0x540] sm:$0xff] }
  0x9c   :  { %1336 = vmatprep.subr.bf16.mxu0 %v1335_v14  ;;  %1368 = vmatprep.subr.bf16.mxu1 %v1367_v15  ;;  %v1393_v14 = vpack.c.bf16 %v461_v9, %v460_v8  ;;  %v1427_v16 = vpack.c.bf16 %v495_v13, %v494_v12  ;;  %v665_v9 = vld [vmem:[#allocation5 + $0x4c0] sm:$0xff]  ;;  %v684_v12 = vld [vmem:[#allocation5 + $0x558] sm:$0xff]  ;;  %v699_v13 = vld [vmem:[#allocation5 + $0x5d0] sm:$0xff] }
  0xa3   :  { %1338 = vmatpush3.bf16.xpose.msra.mxu0 %v1337_v23  ;;  %1370 = vmatpush3.bf16.xpose.msra.mxu1 %v1367_v15  ;;  %v1395_v15 = vpack.c.bf16 %v479_v11, %v478_v10  ;;  %v497_v23 = vld [vmem:[#allocation5 + $0x478] sm:$0xff]  ;;  %v666_v10 = vld [vmem:[#allocation5 + $0x4c8] sm:$0xff]  ;;  %v683_v11 = vld [vmem:[#allocation5 + $0x550] sm:$0xff] }
  0xa4   :  { %1372 = vmatprep.subr.bf16.mxu0 %v1371_v24  ;;  %1404 = vmatprep.subr.bf16.mxu1 %v1403_v25  ;;  %v1397_v24 = vpack.c.bf16 %v463_v18, %v462_v17  ;;  %v1431_v26 = vpack.c.bf16 %v497_v23, %v496_v21  ;;  %v667_v18 = vld [vmem:[#allocation5 + $0x4d0] sm:$0xff]  ;;  %v686_v21 = vld [vmem:[#allocation5 + $0x568] sm:$0xff]  ;;  %v701_v23 = vld [vmem:[#allocation5 + $0x5e0] sm:$0xff] }
  0xaa   :  { %974 = vmatmul.mubr.f32.vlgmr.msra.gmra.mrb[4].mxu0 %v1624_v31  ;;  %1171 = vmatmul.mubr.f32.vlgmr.msra.gmra.mrb[2].mxu1 %v1628_v22 }
  0xab   :  { %1374 = vmatpush3.bf16.xpose.msra.mxu0 %v1373_v33  ;;  %1406 = vmatpush3.bf16.xpose.msra.mxu1 %v1403_v25  ;;  %v1399_v25 = vpack.c.bf16 %v481_v20, %v480_v19  ;;  %v690_v33 = vld [vmem:[#allocation5 + $0x588] sm:$0xff]  ;;  %v668_v19 = vld [vmem:[#allocation5 + $0x4d8] sm:$0xff]  ;;  %v685_v20 = vld [vmem:[#allocation5 + $0x560] sm:$0xff] }
  0xac   :  { %975 = vmatprep.mubr.f32.mxu0 %v1628_v22  ;;  %1376 = vmatprep.subr.bf16.mxu0 %v1375_v34  ;;  %v1401_v34 = vpack.c.bf16 %v465_v28, %v464_v27  ;;  %v1467_v36 = vpack.c.bf16 %v690_v33, %v689_v32  ;;  %v669_v28 = vld [vmem:[#allocation5 + $0x4e0] sm:$0xff]  ;;  %v688_v32 = vld [vmem:[#allocation5 + $0x578] sm:$0xff]  ;;  %v703_v33 = vld [vmem:[#allocation5 + $0x5f0] sm:$0xff] }
  0xad   :  { %1408 = vmatprep.subr.bf16.mxu1 %v1407_v35  ;;  %1205 = vmatprep.mubr.f32.mxu1 %v1624_v31 }
  0xae   :  { %976 = vmatmul.mubr.f32.gmra.mrb[6].mxu0 %v1628_v22 }
  0xaf   :  { %1027 = vmatprep.mubr.f32.mxu0 %v1624_v31 }
  0xb3   :  { %1378 = vmatpush3.bf16.xpose.msra.mxu0 %v1377_v42  ;;  %1410 = vmatpush3.bf16.xpose.msra.mxu1 %v1407_v35  ;;  %v1435_v35 = vpack.c.bf16 %v674_v30, %v673_v29  ;;  %v692_v42 = vld [vmem:[#allocation5 + $0x598] sm:$0xff]  ;;  %v670_v29 = vld [vmem:[#allocation5 + $0x4e8] sm:$0xff]  ;;  %v687_v30 = vld [vmem:[#allocation5 + $0x570] sm:$0xff] }
  0xb4   :  { %1380 = vmatprep.subr.bf16.mxu0 %v1379_v43  ;;  %1412 = vmatprep.subr.bf16.mxu1 %v1411_v44  ;;  %v1437_v43 = vpack.c.bf16 %v658_v38, %v657_v37  ;;  %v1471_v45 = vpack.c.bf16 %v692_v42, %v691_v41  ;;  %v671_v38 = vld [vmem:[#allocation5 + $0x4f0] sm:$0xff] }
  0xbb   :  { %1382 = vmatpush3.bf16.xpose.msra.mxu0 %v1381_v51  ;;  %1414 = vmatpush3.bf16.xpose.msra.mxu1 %v1411_v44  ;;  %v1439_v44 = vpack.c.bf16 %v676_v40, %v675_v39  ;;  %v694_v51 = vld [vmem:[#allocation5 + $0x5a8] sm:$0xff]  ;;  %v672_v39 = vld [vmem:[#allocation5 + $0x4f8] sm:$0xff] }
  0xbc   :  { %1384 = vmatprep.subr.bf16.mxu0 %v1383_v52  ;;  %1416 = vmatprep.subr.bf16.mxu1 %v1415_v53  ;;  %v1441_v52 = vpack.c.bf16 %v660_v47, %v659_v46  ;;  %v1475_v54 = vpack.c.bf16 %v694_v51, %v693_v50  ;;  %v1465_v40 = vpack.c.bf16 %v672_v39, %v671_v38 }
  0xc3   :  { %1386 = vmatpush3.bf16.xpose.msra.mxu0 %v1385_v60  ;;  %1418 = vmatpush3.bf16.xpose.msra.mxu1 %v1415_v53  ;;  %v1443_v53 = vpack.c.bf16 %v678_v49, %v677_v48  ;;  %v696_v60 = vld [vmem:[#allocation5 + $0x5b8] sm:$0xff] }
  0xc4   :  { %1388 = vmatprep.subr.bf16.mxu0 %v1387_v61  ;;  %1420 = vmatprep.subr.bf16.mxu1 %v1419_v62  ;;  %v1445_v61 = vpack.c.bf16 %v662_v56, %v661_v55  ;;  %v1479_v63 = vpack.c.bf16 %v696_v60, %v695_v59 }
  0xcb   :  { %1390 = vmatpush3.bf16.xpose.msra.mxu0 %v1389_v5  ;;  %1422 = vmatpush3.bf16.xpose.msra.mxu1 %v1419_v62  ;;  %v1447_v62 = vpack.c.bf16 %v680_v58, %v679_v57  ;;  %v698_v5 = vld [vmem:[#allocation5 + $0x5c8] sm:$0xff] }
  0xcc   :  { %1392 = vmatprep.subr.bf16.mxu0 %v1391_v6  ;;  %1424 = vmatprep.subr.bf16.mxu1 %v1423_v7  ;;  %v1449_v6 = vpack.c.bf16 %v664_v1, %v663_v0  ;;  %v1483_v8 = vpack.c.bf16 %v698_v5, %v697_v4 }
  0xd3   :  { %1394 = vmatpush3.bf16.xpose.msra.mxu0 %v1393_v14  ;;  %1426 = vmatpush3.bf16.xpose.msra.mxu1 %v1423_v7  ;;  %v1451_v7 = vpack.c.bf16 %v682_v3, %v681_v2  ;;  %v700_v14 = vld [vmem:[#allocation5 + $0x5d8] sm:$0xff] }
  0xd4   :  { %1396 = vmatprep.subr.bf16.mxu0 %v1395_v15  ;;  %1428 = vmatprep.subr.bf16.mxu1 %v1427_v16  ;;  %v1453_v15 = vpack.c.bf16 %v666_v10, %v665_v9  ;;  %v1487_v17 = vpack.c.bf16 %v700_v14, %v699_v13 }
  0xdb   :  { %1398 = vmatpush3.bf16.xpose.msra.mxu0 %v1397_v24  ;;  %1430 = vmatpush3.bf16.xpose.msra.mxu1 %v1427_v16  ;;  %v1455_v16 = vpack.c.bf16 %v684_v12, %v683_v11  ;;  %v702_v24 = vld [vmem:[#allocation5 + $0x5e8] sm:$0xff] }
  0xdc   :  { %1400 = vmatprep.subr.bf16.mxu0 %v1399_v25  ;;  %1432 = vmatprep.subr.bf16.mxu1 %v1431_v26  ;;  %v1457_v25 = vpack.c.bf16 %v668_v19, %v667_v18  ;;  %v1491_v27 = vpack.c.bf16 %v702_v24, %v701_v23 }
  0xe3   :  { %1402 = vmatpush3.bf16.xpose.msra.mxu0 %v1401_v34  ;;  %1434 = vmatpush3.bf16.xpose.msra.mxu1 %v1431_v26  ;;  %v1459_v26 = vpack.c.bf16 %v686_v21, %v685_v20  ;;  %v704_v34 = vld [vmem:[#allocation5 + $0x5f8] sm:$0xff] }
  0xe4   :  { %1436 = vmatprep.subr.bf16.mxu0 %v1435_v35  ;;  %1468 = vmatprep.subr.bf16.mxu1 %v1467_v36  ;;  %v1461_v35 = vpack.c.bf16 %v670_v29, %v669_v28  ;;  %v1495_v37 = vpack.c.bf16 %v704_v34, %v703_v33 }
  0xea   :  { %1028 = vmatmul.mubr.f32.vlgmr.msra.gmra.mrb[8].mxu0 %v1624_v31  ;;  %1206 = vmatmul.mubr.f32.vlgmr.msra.gmra.mrb[4].mxu1 %v1628_v22 }
  0xeb   :  { %1438 = vmatpush3.bf16.xpose.msra.mxu0 %v1437_v43  ;;  %1470 = vmatpush3.bf16.xpose.msra.mxu1 %v1467_v36  ;;  %v1463_v36 = vpack.c.bf16 %v688_v32, %v687_v30 }
  0xec   :  { %1029 = vmatprep.mubr.f32.mxu0 %v1628_v22  ;;  %1440 = vmatprep.subr.bf16.mxu0 %v1439_v44 }
  0xed   :  { %1472 = vmatprep.subr.bf16.mxu1 %v1471_v45  ;;  %1240 = vmatprep.mubr.f32.mxu1 %v1624_v31 }
  0xee   :  { %1030 = vmatmul.mubr.f32.gmra.mrb[10].mxu0 %v1628_v22 }
  0xef   :  { %1081 = vmatprep.mubr.f32.mxu0 %v1624_v31 }
  0xf3   :  { %1442 = vmatpush3.bf16.xpose.msra.mxu0 %v1441_v52  ;;  %1474 = vmatpush3.bf16.xpose.msra.mxu1 %v1471_v45 }
  0xf4   :  { %1444 = vmatprep.subr.bf16.mxu0 %v1443_v53  ;;  %1476 = vmatprep.subr.bf16.mxu1 %v1475_v54 }
  0xfb   :  { %1446 = vmatpush3.bf16.xpose.msra.mxu0 %v1445_v61  ;;  %1478 = vmatpush3.bf16.xpose.msra.mxu1 %v1475_v54 }
  0xfc   :  { %1448 = vmatprep.subr.bf16.mxu0 %v1447_v62  ;;  %1480 = vmatprep.subr.bf16.mxu1 %v1479_v63 }
 0x103   :  { %1450 = vmatpush3.bf16.xpose.msra.mxu0 %v1449_v6  ;;  %1482 = vmatpush3.bf16.xpose.msra.mxu1 %v1479_v63 }
 0x104   :  { %1452 = vmatprep.subr.bf16.mxu0 %v1451_v7  ;;  %1484 = vmatprep.subr.bf16.mxu1 %v1483_v8 }
 0x10b   :  { %1454 = vmatpush3.bf16.xpose.msra.mxu0 %v1453_v15  ;;  %1486 = vmatpush3.bf16.xpose.msra.mxu1 %v1483_v8 }
 0x10c   :  { %1456 = vmatprep.subr.bf16.mxu0 %v1455_v16  ;;  %1488 = vmatprep.subr.bf16.mxu1 %v1487_v17 }
 0x113   :  { %1458 = vmatpush3.bf16.xpose.msra.mxu0 %v1457_v25  ;;  %1490 = vmatpush3.bf16.xpose.msra.mxu1 %v1487_v17 }
 0x114   :  { %1460 = vmatprep.subr.bf16.mxu0 %v1459_v26  ;;  %1492 = vmatprep.subr.bf16.mxu1 %v1491_v27 }
 0x11b   :  { %1462 = vmatpush3.bf16.xpose.msra.mxu0 %v1461_v35  ;;  %1494 = vmatpush3.bf16.xpose.msra.mxu1 %v1491_v27 }
 0x11c   :  { %1464 = vmatprep.subr.bf16.mxu0 %v1463_v36  ;;  %1496 = vmatprep.subr.bf16.mxu1 %v1495_v37 }
 0x123   :  { %1466 = vmatpush3.bf16.xpose.msra.mxu0 %v1465_v40  ;;  %1498 = vmatpush3.bf16.xpose.msra.mxu1 %v1495_v37 }
 0x12a   :  { %1082 = vmatmul.mubr.f32.vlgmr.msra.gmra.mrb[12].mxu0 %v1624_v31  ;;  %1241 = vmatmul.mubr.f32.vlgmr.msra.gmra.mrb[6].mxu1 %v1628_v22 }
 0x12b   :  { %1083 = vmatprep.mubr.f32.mxu0 %v1628_v22 }
 0x12e   :  { %1084 = vmatmul.mubr.f32.gmra.mrb[14].mxu0 %v1628_v22 }
 0x13d   :  { %v156_v41 = vpop.f32.mrb[0].mxu0  ;;  %v1137_v43 = vpop.f32.mrb[0].mxu1 }
 0x13e   :  { %v158_v42 = vpop.f32.mrb[1].mxu0  ;;  %v233_v44 = vpop.f32.mrb[1].mxu1 }
 0x141   :  { %v162_v45 = vpop.f32.mrb[2].mxu0 }
 0x142   :  { %v164_v46 = vpop.f32.mrb[3].mxu0 }
 0x17d   :  { %v357_v47 = vpop.f32.mrb[4].mxu0  ;;  %v1172_v49 = vpop.f32.mrb[2].mxu1 }
 0x17e   :  { %v443_v48 = vmax.f32 %v156_v41, %v357_v47  ;;  %v359_v50 = vpop.f32.mrb[5].mxu0  ;;  %v448_v51 = vmax.f32 %v1137_v43, %v1172_v49  ;;  %v434_v53 = vpop.f32.mrb[3].mxu1 }
 0x17f   :  { %v444_v52 = vmax.f32 %v158_v42, %v359_v50  ;;  %v445_v31 = vmax.f32 %v233_v44, %v434_v53 }
 0x181   :  { %v363_v54 = vpop.f32.mrb[6].mxu0 }
 0x182   :  { %v446_v55 = vmax.f32 %v162_v45, %v363_v54  ;;  %v365_v56 = vpop.f32.mrb[7].mxu0 }
 0x183   :  { %v447_v57 = vmax.f32 %v164_v46, %v365_v56 }
 0x1bd   :  { %v564_v58 = vpop.f32.mrb[8].mxu0  ;;  %v1207_v59 = vpop.f32.mrb[4].mxu1 }
 0x1be   :  { %v650_v22 = vmax.f32 %v443_v48, %v564_v58  ;;  %v566_v60 = vpop.f32.mrb[9].mxu0  ;;  %v655_v61 = vmax.f32 %v448_v51, %v1207_v59  ;;  %v641_v63 = vpop.f32.mrb[5].mxu1 }
 0x1bf   :  { %v651_v62 = vmax.f32 %v444_v52, %v566_v60  ;;  %v652_v0 = vmax.f32 %v445_v31, %v641_v63 }
 0x1c1   :  { %v570_v1 = vpop.f32.mrb[10].mxu0 }
 0x1c2   :  { %v653_v2 = vmax.f32 %v446_v55, %v570_v1  ;;  %v572_v3 = vpop.f32.mrb[11].mxu0 }
 0x1c3   :  { %v654_v4 = vmax.f32 %v447_v57, %v572_v3 }
 0x1fd   :  { %v771_v5 = vpop.f32.mrb[12].mxu0  ;;  %v1242_v7 = vpop.f32.mrb[6].mxu1 }
 0x1fe   :  { %v857_v6 = vmax.f32 %v650_v22, %v771_v5  ;;  %v773_v8 = vpop.f32.mrb[13].mxu0  ;;  %v862_v9 = vmax.f32 %v655_v61, %v1242_v7  ;;  %v848_v11 = vpop.f32.mrb[7].mxu1 }
 0x1ff   :  { %v858_v10 = vmax.f32 %v651_v62, %v773_v8  ;;  %v859_v12 = vmax.f32 %v652_v0, %v848_v11 }
 0x200   :  { %863 = vst [vmem:[#allocation7] sm:$0xff] %v857_v6  ;;  %868 = vst [vmem:[#allocation7 + $0x28] sm:$0xff] %v862_v9 }
 0x201   :  { %864 = vst [vmem:[#allocation7 + $0x8] sm:$0xff] %v858_v10  ;;  %v777_v13 = vpop.f32.mrb[14].mxu0  ;;  %865 = vst [vmem:[#allocation7 + $0x10] sm:$0xff] %v859_v12 }
 0x202   :  { %v860_v14 = vmax.f32 %v653_v2, %v777_v13  ;;  %v779_v15 = vpop.f32.mrb[15].mxu0 }
 0x203   :  { %v861_v16 = vmax.f32 %v654_v4, %v779_v15 }
 0x204   :  { %866 = vst [vmem:[#allocation7 + $0x18] sm:$0xff] %v860_v14 }
 0x205   :  { %867 = vst [vmem:[#allocation7 + $0x20] sm:$0xff] %v861_v16 }
 0x206   :  { %1561 = shalt.err (!%p1558_p6)
}
 0x207   :  { %s1562_s10 = scalar_lea.hbm %s1666_s2, 768 }
 0x208   :  { %p1563_p7 = scmp.ne.s32.totalorder %s1666_s2, %s1562_s10  ;;  %p1566_p8 = scmp.lt.u32.totalorder %s1562_s10, %s1666_s2 }
 0x20a   :  { %p1568_p9 = pnand %p1566_p8, %p1563_p7 }
 0x20c   :  { %1571 = shalt.err (!%p1568_p9)
}
 0x20d   :  { %s1583_s15 = smov 384   ;;  %s1584_s16 = smov 24  }
 0x20e   :  { %880 = dma.vmem_to_hbm [thread:$0]  %s875_s6, 768, %s1666_s2, [#allocation4], %s1583_s15, %s1583_s15, %s1584_s16  }
 0x20f   :  { %1576 = dma.done.wait [#allocation4], 768  }
 0x210   :  { %1577 = vsyncadd [#allocation4], 4294966528 }
 0x211   :  { %884 = vsyncpa [#allocation3], 1 }
 0x212   :  { %885 = vsyncpa [#allocation6], 1 }
 0x213   :  { %886 = vsyncpa [#allocation4], 1 }

</bundles_post_ra>
